<compile_context>
chip_gen: v6e
topology: v6e:2x2x1
jax: 0.10.0
libtpu: 0.0.40
codegen_flags: <defaults>
</compile_context>

<pallas_src>
import functools

import jax
import jax.numpy as jnp
from jax.experimental import pallas as pl
from jax.experimental.pallas import tpu as pltpu

_LANE = 128


def _round_up(x, m):
    return (x + m - 1) // m * m


def _round_down(x, m):
    return max(m, (x // m) * m)


def _vmem_capacity_bytes():
    """Physical per-core VMEM; conservative (v7x-sized) fallback if unknown."""
    try:
        info = pltpu.get_tpu_info()
        cap = getattr(info, "vmem_capacity_bytes", None)
        if cap:
            return int(cap)
    except Exception:
        pass
    return 64 * 2**20


def _in_spec(block_shape, index_map, buffers):
    """Input BlockSpec with optional >2-deep pipelining (graceful fallback)."""
    buffered = getattr(pl, "Buffered", None)
    if buffers > 2 and buffered is not None:
        try:
            return pl.BlockSpec(block_shape, index_map,
                                pipeline_mode=buffered(buffers))
        except TypeError:  # BlockSpec without pipeline_mode support
            pass
    return pl.BlockSpec(block_shape, index_map)


def _ce0_rows_kernel(x_ref, o_ref, *, fast_bf16_exp=False):
    """x_ref: (tb, C) logits block.  o_ref: (tb, 1) f32 per-row CE vs class 0."""
    # Row max in the native dtype (exact for bf16); only the (tb,1) max is f32.
    m = jnp.max(x_ref[...], axis=1, keepdims=True)
    mf = m.astype(jnp.float32)
    if fast_bf16_exp and x_ref.dtype == jnp.bfloat16:
        # bf16 exp on the EUP (v6e/v7x), accumulate the sum in f32.
        p = jnp.exp(x_ref[...] - m).astype(jnp.float32)
    else:
        # f32 upcast fused into the exp expression (per-vreg, no tile copy).
        p = jnp.exp(x_ref[...].astype(jnp.float32) - mf)
    s = jnp.sum(p, axis=1, keepdims=True)
    o_ref[...] = jnp.log(s) + mf - x_ref[:, 0:1].astype(jnp.float32)


def _per_row_ce0(x, *, tile=None, block_bytes=None, input_buffers=2,
                 fast_bf16_exp=False):
    """Per-row cross-entropy against class 0.  x: (N, C).  Returns (N,) f32."""
    n, c = x.shape
    itemsize = jnp.dtype(x.dtype).itemsize
    sublane = 32 // itemsize              # 8 for f32, 16 for bf16 (packed rows)

    # --- generation-aware budgets -------------------------------------------
    capacity = _vmem_capacity_bytes()
    vmem_ceiling = capacity * 3 // 4      # never ask for all of v7x's 64 MiB
    if block_bytes is None:
        block_bytes = 16 * 2**20 if capacity >= 96 * 2**20 else 8 * 2**20

    c_pad = _round_up(c, _LANE)           # VMEM lane padding of one logits row
    in_row = c_pad * itemsize             # input bytes / row / buffer (padded)
    out_row = _LANE * 4                   # (tb,1) f32 out block pads to 128 lanes
    bufs_plan = max(2, int(input_buffers))
    per_row_pipe = bufs_plan * in_row + 2 * out_row

    budget = max(vmem_ceiling - (4 << 20), 8 << 20)
    cap_by_block = _round_down(block_bytes // in_row, sublane)
    cap_by_vmem = _round_down(budget // per_row_pipe, sublane)
    cap = max(sublane, min(cap_by_block, cap_by_vmem))

    # --- tile selection (>=2 steps by default so both v7x TCs are used) ------
    if tile is not None:
        tb = n if tile >= n else max(sublane, _round_down(min(tile, n), sublane))
    else:
        tb = min(cap, _round_up(pl.cdiv(n, 2), sublane))
    if tb >= n:
        tb = n                            # single full block (legal: equals dim)
    steps = pl.cdiv(n, tb)
    bufs = bufs_plan if steps >= 3 else 2

    vmem_need = bufs * tb * in_row + 2 * _round_up(tb, 8) * out_row
    vmem_limit = int(min(vmem_ceiling, max(32 * 2**20, vmem_need + (2 << 20))))

    cost = pl.CostEstimate(
        flops=3 * n * c,
        transcendentals=n * c + n,
        bytes_accessed=n * c * itemsize + n * 4,
    )

    kernel = functools.partial(_ce0_rows_kernel, fast_bf16_exp=fast_bf16_exp)
    out = pl.pallas_call(
        kernel,
        out_shape=jax.ShapeDtypeStruct((n, 1), jnp.float32),
        grid=(steps,),
        in_specs=[_in_spec((tb, c), lambda i: (i, 0), bufs)],
        out_specs=pl.BlockSpec((tb, 1), lambda i: (i, 0)),
        compiler_params=pltpu.CompilerParams(
            dimension_semantics=("parallel",),
            vmem_limit_bytes=vmem_limit),
        cost_estimate=cost,
    )(x)
    return out[:, 0]


def contrastive_loss(inputs, reduction="mean", *, tile=None, block_bytes=None,
                     input_buffers=2, fast_bf16_exp=False):
    """ContrastiveLoss.forward: CE of (N, C) logits against class 0."""
    if inputs.ndim != 2:
        raise ValueError(f"expected (N, C) logits, got shape {inputs.shape}")
    per_row = _per_row_ce0(inputs, tile=tile, block_bytes=block_bytes,
                           input_buffers=input_buffers,
                           fast_bf16_exp=fast_bf16_exp)
    if reduction == "mean":
        return jnp.mean(per_row)
    if reduction == "sum":
        return jnp.sum(per_row)
    if reduction == "none":
        return per_row
    raise ValueError(f"unsupported reduction: {reduction!r}")


if __name__ == "__main__":
    key = jax.random.PRNGKey(0)
    k1, k2, k3, k4 = jax.random.split(key, 4)

    def ref_loss(x, reduction="mean"):
        xf = x.astype(jnp.float32)
        per_row = jax.scipy.special.logsumexp(xf, axis=-1) - xf[:, 0]
        if reduction == "mean":
            return jnp.mean(per_row)
        if reduction == "sum":
            return jnp.sum(per_row)
        return per_row

    # 1) small f32, C < 128 (lane-padded rows), single block, default tiling.
    x1 = jax.random.normal(k1, (8, 32), dtype=jnp.float32)
    got1 = jax.block_until_ready(contrastive_loss(x1))
    exp1 = ref_loss(x1)
    assert jnp.allclose(got1, exp1, rtol=1e-5, atol=1e-5), (got1, exp1)

    # 2) bf16 logits, explicit tile -> multi-step grid with ragged last tile.
    x2 = (0.5 * jax.random.normal(k2, (300, 48))).astype(jnp.bfloat16)
    got2 = jax.block_until_ready(contrastive_loss(x2, tile=128))
    exp2 = ref_loss(x2)
    assert jnp.allclose(got2, exp2, rtol=1e-4, atol=1e-4), (got2, exp2)

    # 3) C >= 128, 'sum' reduction, small explicit tile, ragged last tile.
    x3 = jax.random.normal(k3, (40, 256), dtype=jnp.float32)
    got3 = jax.block_until_ready(contrastive_loss(x3, reduction="sum", tile=16))
    exp3 = ref_loss(x3, "sum")
    assert jnp.allclose(got3, exp3, rtol=1e-5, atol=1e-4), (got3, exp3)

    # 4) default auto-tiling (splits into >=2 blocks), 'none' reduction.
    x4 = jax.random.normal(k4, (200, 64), dtype=jnp.float32)
    got4 = jax.block_until_ready(contrastive_loss(x4, reduction="none"))
    exp4 = ref_loss(x4, "none")
    assert got4.shape == (200,)
    assert jnp.allclose(got4, exp4, rtol=1e-5, atol=1e-5)

    # 5) optional bf16-exp fast path (looser tolerance).
    got5 = jax.block_until_ready(contrastive_loss(x2, fast_bf16_exp=True))
    assert jnp.allclose(got5, exp2, rtol=5e-2, atol=5e-2), (got5, exp2)

    print("KERNEL_OK")
</pallas_src>

<mosaic_0001>
module attributes {stable_mosaic.version = 11 : i64} {
  func.func @_ce0_rows_kernel(%arg0: i32, %arg1: memref<8x32xf32, #tpu.memory_space<vmem>>, %arg2: memref<8x1xf32, #tpu.memory_space<vmem>>) attributes {dimension_semantics = [#tpu.dimension_semantics<parallel>], iteration_bounds = array<i64: 1>, scalar_prefetch = 0 : i64, scratch_operands = 0 : i64, tpu.core_type = #tpu.core_type<tc>, window_params = [{transform_indices = @transform_0, window_bounds = array<i64: 8, 32>}, {transform_indices = @transform_1, window_bounds = array<i64: 8, 1>}]} {
    %c0 = arith.constant 0 : index
    %c0_0 = arith.constant 0 : index
    %0 = vector.load %arg1[%c0, %c0_0] : memref<8x32xf32, #tpu.memory_space<vmem>>, vector<8x32xf32>
    %cst = arith.constant dense<0xFF800000> : vector<8xf32>
    %1 = vector.multi_reduction <maximumf>, %0, %cst [1] : vector<8x32xf32> to vector<8xf32>
    %2 = vector.shape_cast %1 : vector<8xf32> to vector<8x1xf32>
    %c0_1 = arith.constant 0 : index
    %c0_2 = arith.constant 0 : index
    %3 = vector.load %arg1[%c0_1, %c0_2] : memref<8x32xf32, #tpu.memory_space<vmem>>, vector<8x32xf32>
    %4 = vector.broadcast %2 : vector<8x1xf32> to vector<8x32xf32>
    %5 = arith.subf %3, %4 : vector<8x32xf32>
    %6 = math.exp %5 : vector<8x32xf32>
    %cst_3 = arith.constant dense<0.000000e+00> : vector<8xf32>
    %7 = vector.multi_reduction <add>, %6, %cst_3 [1] : vector<8x32xf32> to vector<8xf32>
    %8 = vector.shape_cast %7 : vector<8xf32> to vector<8x1xf32>
    %9 = math.log %8 : vector<8x1xf32>
    %10 = arith.addf %9, %2 : vector<8x1xf32>
    %c0_4 = arith.constant 0 : index
    %c0_5 = arith.constant 0 : index
    %11 = vector.load %arg1[%c0_4, %c0_5] : memref<8x32xf32, #tpu.memory_space<vmem>>, vector<8x1xf32>
    %12 = arith.subf %10, %11 : vector<8x1xf32>
    %c0_6 = arith.constant 0 : index
    %c0_7 = arith.constant 0 : index
    %13 = vector.load %arg2[%c0_6, %c0_7] : memref<8x1xf32, #tpu.memory_space<vmem>>, vector<8x1xf32>
    tpu.vector_store %arg2[%c0_6, %c0_7], %12 {strides = array<i32>} : memref<8x1xf32, #tpu.memory_space<vmem>>, vector<8x1xf32>,
    return
  }
  func.func @transform_0(%arg0: i32) -> (i32, i32) {
    %c0_i32 = arith.constant 0 : i32
    %c0_i32_0 = arith.constant 0 : i32
    return %arg0, %c0_i32 : i32, i32
  }
  func.func @transform_1(%arg0: i32) -> (i32, i32) {
    %c0_i32 = arith.constant 0 : i32
    %c0_i32_0 = arith.constant 0 : i32
    return %arg0, %c0_i32 : i32, i32
  }
}

</mosaic_0001>

<bundles_post_ra>
// kernel: tpu_custom_call.1
= control target key start
LH: loop header
LB: loop body
LE: loop exit
PB: predicated region body
PF: predicated region fallthrough
CT: control target
= control target key end

     0   :  { %6 = vsyncpa [#allocation3], 0  ;;  %s69_s6 = smov [#allocation2]   ;;  %s86_s0 = inlined_call_operand.hbm [shape: f32[8,32], index: 0, kind: input, shape index: {}]   ;;  %s87_s1 = inlined_call_operand.vmem [shape: f32[8,1], index: 1, kind: output, shape index: {}]  }
   0x1   :  { %s13_s7 = sshll.u32 %s69_s6, 4  ;;  %s14_s7 = int_to_ptr.vmem [resolvable:$true] %s13_s7 }
   0x2   :  { %s55_s8 = scalar_lea.vmem %s14_s7, 128  ;;  %p60_p1 = scmp.lt.s32.totalorder %s14_s7, %s14_s7 }
   0x3   :  { %p56_p0 = scmp.ne.s32.totalorder %s14_s7, %s55_s8  ;;  %p61_p2 = scmp.lt.s32.totalorder %s55_s8, %s55_s8 }
   0x5   :  { %p62_p3 = por %p61_p2, %p60_p1 }
   0x7   :  { %p63_p4 = pnand %p62_p3, %p56_p0 }
   0x9   :  { %66 = shalt.err (!%p63_p4)
}
   0xa   :  { %16 = dma.hbm_to_vmem [thread:$0]  %s86_s0, 128, %s14_s7, [#allocation3]  }
   0xb   :  { %67 = dma.done.wait [#allocation3], 128  }
   0xc   :  { %68 = vsyncadd [#allocation3], 4294967168  ;;  %vm21_vm0 = vcmask 261120   ;;  %v20_v0 = vld [vmem:[#allocation2] sm:$0xff]  ;;  %vm35_vm1 = vcmask 7168  }
   0xd   :  { %v22_v1 = vsel %vm21_vm0, %v20_v0, -inf }
   0xe   :  { %23 = vmax.xlane.f32.xlu0 %v22_v1 }
  0x97   :  { %v24_v2 = vpop.xlane.xlu0 %23 }
  0x98   :  { %v25_v3 = vsub.f32 %v20_v0, %v24_v2 }
  0x9a   :  { %v26_v4 = vmul.f32 1.442695, %v25_v3 }
  0x9c   :  { %43 = vpow2.f32 %v26_v4 }
  0xa9   :  { %v44_v5 = vpop.eup %43 }
  0xaa   :  { %v28_v6 = vsel %vm21_vm0, %v44_v5, 0.0 }
  0xab   :  { %29 = vadd.xlane.f32.xlu0 %v28_v6 }
 0x134   :  { %v30_v7 = vpop.xlane.xlu0 %29 }
 0x135   :  { %45 = vlog2.f32 %v30_v7 }
 0x142   :  { %v46_v8 = vpop.eup %45 }
 0x143   :  { %v32_v9 = vmul.f32 0.6931472, %v46_v8 }
 0x145   :  { %v33_v10 = vadd.f32 %v32_v9, %v24_v2 }
 0x147   :  { %v34_v11 = vsub.f32 %v33_v10, %v20_v0 }
 0x149   :  { %36 = vst.msk [vmem:[%s87_s1] sm:$0xff] %vm35_vm1, %v34_v11 }
 0x14a   :  { %41 = vsyncpa [#allocation3], 1 }

</bundles_post_ra>
